<compile_context>
chip_gen: v7x
topology: tpu7x:2x2x1
jax: 0.10.0
libtpu: 0.0.40
codegen_flags: <defaults>
</compile_context>

<pallas_src>
import functools

import jax
import jax.numpy as jnp
from jax import lax
from jax.experimental import pallas as pl
from jax.experimental.pallas import tpu as pltpu

_MAX_LANE_TILE = 2048  # lanes per spatial tile (multiple of 128)


def _round_up(x, m):
    return (x + m - 1) // m * m


def _vmem_limits():
    """(scoped vmem limit, double-buffered input-block budget) in bytes."""
    cap = 64 * 1024 * 1024  # conservative default (v7x per-TC VMEM)
    try:
        cap = int(pltpu.get_tpu_info().vmem_capacity_bytes)
    except Exception:
        pass
    limit = min(cap * 3 // 4, 96 * 1024 * 1024)   # 96 MiB on v5e/v6e, 48 MiB on v7x
    block_budget = limit // 2                     # leave room for f32 temps + scratch
    return limit, block_budget


def _num_tensorcores():
    try:
        kind = getattr(jax.devices()[0], "device_kind", "").lower()
    except Exception:
        return 1
    return 2 if "v7" in kind else 1


def _choose_tiles(bc, hw, itemsize, block_budget):
    """Pick (row_tile multiple of 8, lane_tile multiple of 128)."""
    lane_tile = min(_round_up(hw, 128), _MAX_LANE_TILE)

    # v7x-only: 2 TensorCores per chip -> make sure the "parallel" lane axis
    # has at least 2 grid steps so both cores get work.
    if _num_tensorcores() >= 2 and pl.cdiv(hw, lane_tile) == 1 and lane_tile >= 256:
        lane_tile = max(128, _round_up(lane_tile // 2, 128))

    # Rows per step: largest multiple of 8 such that the double-buffered x/y
    # blocks plus ~1x block worth of f32 upcast/abs-diff temporaries fit.
    per_row_bytes = lane_tile * (2 * 2 * itemsize + 2 * 4)
    max_rows = max(8, (block_budget // max(per_row_bytes, 1)) // 8 * 8)
    row_tile = min(_round_up(bc, 8), max_rows)
    return row_tile, lane_tile


def _mae_kernel(x_ref, y_ref, o_ref, acc_ref, *,
                inv_bc, bc, hw, mask_rows, mask_lanes):
    # x_ref/y_ref: (row_tile, lane_tile) input blocks.
    # o_ref:       (1, lane_tile) f32 output block, resident across the row axis.
    # acc_ref:     (8, lane_tile) f32 scratch (per-sublane partial sums).
    r = pl.program_id(1)
    nr = pl.num_programs(1)

    @pl.when(r == 0)
    def _():
        acc_ref[...] = jnp.zeros_like(acc_ref)

    # f32 compute everywhere (safe on v5e: no bf16 VPU); HBM-bandwidth bound,
    # so the elementwise work hides under the DMA.
    d = jnp.abs(x_ref[...].astype(jnp.float32) - y_ref[...].astype(jnp.float32))
    rows, lanes = d.shape

    # Mask out-of-bounds rows/lanes of partial edge blocks (inputs are NOT
    # padded host-side, so those elements are garbage).
    if mask_rows or mask_lanes:
        valid = None
        if mask_rows:
            row_ids = lax.broadcasted_iota(jnp.int32, (rows, lanes), 0) + r * rows
            valid = row_ids < bc
        if mask_lanes:
            lane_ids = (lax.broadcasted_iota(jnp.int32, (rows, lanes), 1)
                        + pl.program_id(0) * lanes)
            lv = lane_ids < hw
            valid = lv if valid is None else (valid & lv)
        d = jnp.where(valid, d, 0.0)

    # Accumulate into 8 sublanes: sums corresponding sublanes across vreg-row
    # groups (pure VALU adds, no XLU / partial-sublane RMW in the inner loop).
    if rows == 8:
        acc_ref[...] += d
    else:
        acc_ref[...] += jnp.sum(d.reshape(rows // 8, 8, lanes), axis=0)

    @pl.when(r == nr - 1)
    def _():
        # Single cross-sublane collapse + scale + lane-dense store per lane tile.
        o_ref[...] = (jnp.sum(acc_ref[...], axis=0, keepdims=True) * inv_bc
                      ).astype(o_ref.dtype)


def mae_loss(x, y):
    assert x.shape == y.shape, "x and y must have the same shape"
    assert x.ndim >= 2, "expected at least (batch, channel, ...) input"
    b, c = x.shape[0], x.shape[1]
    rest = x.shape[2:]
    hw = 1
    for s in rest:
        hw *= s
    bc = b * c
    itemsize = jnp.dtype(x.dtype).itemsize

    vmem_limit, block_budget = _vmem_limits()
    row_tile, lane_tile = _choose_tiles(bc, hw, itemsize, block_budget)

    num_lane_tiles = pl.cdiv(hw, lane_tile)
    num_row_tiles = pl.cdiv(bc, row_tile)
    hw_pad = num_lane_tiles * lane_tile

    xf = x.reshape(bc, hw)
    yf = y.reshape(bc, hw)

    kernel = functools.partial(
        _mae_kernel,
        inv_bc=1.0 / float(bc),
        bc=bc,
        hw=hw,
        mask_rows=(bc % row_tile != 0),
        mask_lanes=(hw % lane_tile != 0),
    )

    cost = pl.CostEstimate(
        flops=3 * bc * hw,
        transcendentals=0,
        bytes_accessed=2 * bc * hw * itemsize + hw_pad * 4,
    )

    out = pl.pallas_call(
        kernel,
        out_shape=jax.ShapeDtypeStruct((1, hw_pad), jnp.float32),
        grid=(num_lane_tiles, num_row_tiles),  # (spatial: parallel, rows: reduce)
        in_specs=[
            pl.BlockSpec((row_tile, lane_tile), lambda i, r: (r, i)),
            pl.BlockSpec((row_tile, lane_tile), lambda i, r: (r, i)),
        ],
        out_specs=pl.BlockSpec((1, lane_tile), lambda i, r: (0, i)),
        scratch_shapes=[pltpu.VMEM((8, lane_tile), jnp.float32)],
        compiler_params=pltpu.CompilerParams(
            dimension_semantics=("parallel", "arbitrary"),
            vmem_limit_bytes=vmem_limit,
        ),
        cost_estimate=cost,
    )(xf, yf)

    return out[0, :hw].reshape(rest)


if __name__ == "__main__":
    key = jax.random.PRNGKey(0)
    kx, ky = jax.random.split(key)
    B, C, H, W = 2, 4, 16, 16
    x = jax.random.normal(kx, (B, C, H, W), dtype=jnp.float32)
    y = jax.random.normal(ky, (B, C, H, W), dtype=jnp.float32)

    loss = mae_loss(x, y)
    jax.block_until_ready(loss)

    # reference check (plain JAX)
    ref = jnp.mean(jnp.mean(jnp.abs(x - y), axis=1), axis=0)
    assert loss.shape == (H, W)
    assert jnp.allclose(loss, ref, rtol=1e-5, atol=1e-5)

    print("KERNEL_OK")
</pallas_src>

<mosaic_0001>
module attributes {stable_mosaic.version = 11 : i64} {
  func.func @_mae_kernel(%arg0: i32, %arg1: i32, %arg2: memref<8x256xf32, #tpu.memory_space<vmem>>, %arg3: memref<8x256xf32, #tpu.memory_space<vmem>>, %arg4: memref<1x256xf32, #tpu.memory_space<vmem>>, %arg5: memref<8x256xf32, #tpu.memory_space<vmem>>) attributes {dimension_semantics = [#tpu.dimension_semantics<parallel>, #tpu.dimension_semantics<arbitrary>], iteration_bounds = array<i64: 1, 1>, scalar_prefetch = 0 : i64, scratch_operands = 1 : i64, tpu.core_type = #tpu.core_type<tc>, window_params = [{transform_indices = @transform_0, window_bounds = array<i64: 8, 256>}, {transform_indices = @transform_1, window_bounds = array<i64: 8, 256>}, {transform_indices = @transform_2, window_bounds = array<i64: 1, 256>}]} {
    %c0_i32 = arith.constant 0 : i32
    %0 = arith.cmpi eq, %arg1, %c0_i32 : i32
    %1 = arith.extui %0 : i1 to i32
    %c0_i32_0 = arith.constant 0 : i32
    %2 = arith.cmpi ne, %1, %c0_i32_0 : i32
    scf.if %2 {
      %cst = arith.constant 0.000000e+00 : f32
      %13 = vector.broadcast %cst : f32 to vector<8x256xf32>
      %c0_10 = arith.constant 0 : index
      %c0_11 = arith.constant 0 : index
      %14 = vector.load %arg5[%c0_10, %c0_11] : memref<8x256xf32, #tpu.memory_space<vmem>>, vector<8x256xf32>
      tpu.vector_store %arg5[%c0_10, %c0_11], %13 {strides = array<i32>} : memref<8x256xf32, #tpu.memory_space<vmem>>, vector<8x256xf32>,
    } else {
    }
    %c0 = arith.constant 0 : index
    %c0_1 = arith.constant 0 : index
    %3 = vector.load %arg2[%c0, %c0_1] : memref<8x256xf32, #tpu.memory_space<vmem>>, vector<8x256xf32>
    %c0_2 = arith.constant 0 : index
    %c0_3 = arith.constant 0 : index
    %4 = vector.load %arg3[%c0_2, %c0_3] : memref<8x256xf32, #tpu.memory_space<vmem>>, vector<8x256xf32>
    %5 = arith.subf %3, %4 : vector<8x256xf32>
    %6 = math.absf %5 : vector<8x256xf32>
    %c0_4 = arith.constant 0 : index
    %c0_5 = arith.constant 0 : index
    %7 = vector.load %arg5[%c0_4, %c0_5] : memref<8x256xf32, #tpu.memory_space<vmem>>, vector<8x256xf32>
    %8 = arith.addf %7, %6 : vector<8x256xf32>
    %c0_6 = arith.constant 0 : index
    %c0_7 = arith.constant 0 : index
    %9 = vector.load %arg5[%c0_6, %c0_7] : memref<8x256xf32, #tpu.memory_space<vmem>>, vector<8x256xf32>
    tpu.vector_store %arg5[%c0_6, %c0_7], %8 {strides = array<i32>} : memref<8x256xf32, #tpu.memory_space<vmem>>, vector<8x256xf32>,
    %c0_i32_8 = arith.constant 0 : i32
    %10 = arith.cmpi eq, %arg1, %c0_i32_8 : i32
    %11 = arith.extui %10 : i1 to i32
    %c0_i32_9 = arith.constant 0 : i32
    %12 = arith.cmpi ne, %11, %c0_i32_9 : i32
    scf.if %12 {
      %c0_10 = arith.constant 0 : index
      %c0_11 = arith.constant 0 : index
      %13 = vector.load %arg5[%c0_10, %c0_11] : memref<8x256xf32, #tpu.memory_space<vmem>>, vector<8x256xf32>
      %cst = arith.constant dense<0.000000e+00> : vector<256xf32>
      %14 = vector.multi_reduction <add>, %13, %cst [0] : vector<8x256xf32> to vector<256xf32>
      %15 = vector.shape_cast %14 : vector<256xf32> to vector<1x256xf32>
      %cst_12 = arith.constant 1.250000e-01 : f32
      %16 = vector.broadcast %cst_12 : f32 to vector<1x256xf32>
      %17 = arith.mulf %15, %16 : vector<1x256xf32>
      %c0_13 = arith.constant 0 : index
      %c0_14 = arith.constant 0 : index
      %18 = vector.load %arg4[%c0_13, %c0_14] : memref<1x256xf32, #tpu.memory_space<vmem>>, vector<1x256xf32>
      tpu.vector_store %arg4[%c0_13, %c0_14], %17 {strides = array<i32>} : memref<1x256xf32, #tpu.memory_space<vmem>>, vector<1x256xf32>,
    } else {
    }
    return
  }
  func.func @transform_0(%arg0: i32, %arg1: i32) -> (i32, i32) {
    %c0_i32 = arith.constant 0 : i32
    return %arg1, %arg0 : i32, i32
  }
  func.func @transform_1(%arg0: i32, %arg1: i32) -> (i32, i32) {
    %c0_i32 = arith.constant 0 : i32
    return %arg1, %arg0 : i32, i32
  }
  func.func @transform_2(%arg0: i32, %arg1: i32) -> (i32, i32) {
    %c0_i32 = arith.constant 0 : i32
    %c0_i32_0 = arith.constant 0 : i32
    return %c0_i32, %arg0 : i32, i32
  }
}

</mosaic_0001>

<bundles_post_ra>
// kernel: tpu_custom_call.1
= control target key start
LH: loop header
LB: loop body
LE: loop exit
PB: predicated region body
PF: predicated region fallthrough
CT: control target
= control target key end

     0   :  { %7 = vsyncpa [#allocation4], 0  ;;  %s245_s0 = inlined_call_operand.hbm [shape: f32[8,256], index: 0, kind: input, shape index: {}]   ;;  %s246_s1 = inlined_call_operand.hbm [shape: f32[8,256], index: 1, kind: input, shape index: {}]   ;;  %s247_s2 = inlined_call_operand.hbm [shape: f32[1,256], index: 2, kind: output, shape index: {}]  }
   0x1   :  { %8 = vsyncpa [#allocation7], 0 }
   0x2   :  { %9 = vsyncpa [#allocation5], 0  ;;  %s190_s9 = smov [#allocation3]   ;;  %s191_s11 = smov [#allocation6]  }
   0x3   :  { %s16_s10 = sshll.u32 %s190_s9, 4  ;;  %s26_s12 = sshll.u32 %s191_s11, 4  ;;  %s17_s10 = int_to_ptr.vmem [resolvable:$true] %s16_s10  ;;  %s27_s12 = int_to_ptr.vmem [resolvable:$true] %s26_s12 }
   0x4   :  { %s118_s15 = scalar_lea.hbm %s245_s0, 256 }
   0x5   :  { %p119_p0 = scmp.ne.s32.totalorder %s245_s0, %s118_s15  ;;  %p122_p1 = scmp.lt.u32.totalorder %s118_s15, %s245_s0 }
   0x7   :  { %p124_p2 = pnand %p122_p1, %p119_p0 }
   0x9   :  { %127 = shalt.err (!%p124_p2)
}
   0xa   :  { %s128_s20 = scalar_lea.vmem %s17_s10, 256  ;;  %p133_p4 = scmp.lt.s32.totalorder %s17_s10, %s17_s10 }
   0xb   :  { %p129_p3 = scmp.ne.s32.totalorder %s17_s10, %s128_s20  ;;  %p134_p5 = scmp.lt.s32.totalorder %s128_s20, %s128_s20 }
   0xd   :  { %p135_p6 = por %p134_p5, %p133_p4 }
   0xf   :  { %p136_p7 = pnand %p135_p6, %p129_p3 }
  0x11   :  { %139 = shalt.err (!%p136_p7)
}
  0x12   :  { %19 = dma.hbm_to_vmem [thread:$0]  %s245_s0, 256, %s17_s10, [#allocation4]  }
  0x13   :  { %s140_s25 = scalar_lea.hbm %s246_s1, 256 }
  0x14   :  { %p141_p8 = scmp.ne.s32.totalorder %s246_s1, %s140_s25  ;;  %p144_p9 = scmp.lt.u32.totalorder %s140_s25, %s246_s1 }
  0x16   :  { %p146_p10 = pnand %p144_p9, %p141_p8 }
  0x18   :  { %149 = shalt.err (!%p146_p10)
}
  0x19   :  { %s150_s30 = scalar_lea.vmem %s27_s12, 256  ;;  %p155_p12 = scmp.lt.s32.totalorder %s27_s12, %s27_s12 }
  0x1a   :  { %p151_p11 = scmp.ne.s32.totalorder %s27_s12, %s150_s30  ;;  %p156_p13 = scmp.lt.s32.totalorder %s150_s30, %s150_s30 }
  0x1c   :  { %p157_p0 = por %p156_p13, %p155_p12 }
  0x1e   :  { %p158_p1 = pnand %p157_p0, %p151_p11 }
  0x20   :  { %161 = shalt.err (!%p158_p1)
}
  0x21   :  { %29 = dma.hbm_to_vmem [thread:$0]  %s246_s1, 256, %s27_s12, [#allocation7]  }
  0x22   :  { %184 = dma.done.wait [#allocation4], 256  }
  0x23   :  { %185 = vsyncadd [#allocation4], 4294967040 }
  0x24   :  { %186 = dma.done.wait [#allocation7], 256  }
  0x25   :  { %187 = vsyncadd [#allocation7], 4294967040  ;;  %v42_v0 = vld [vmem:[#allocation3] sm:$0xff]  ;;  %v43_v1 = vld [vmem:[#allocation3 + $0x8] sm:$0xff]  ;;  %v192_v14 = vmov 1966171168   ;;  %v81_v16 = vlaneseq }
  0x26   :  { %v44_v2 = vld [vmem:[#allocation6] sm:$0xff]  ;;  %v45_v3 = vld [vmem:[#allocation6 + $0x8] sm:$0xff]  ;;  %v79_v15 = vunpack.c.l.s4 %v192_v14  ;;  %s193_s1 = smov [#allocation8]  }
  0x27   :  { %v46_v4 = vsub.f32 %v42_v0, %v44_v2  ;;  %v47_v5 = vsub.f32 %v43_v1, %v45_v3  ;;  %v82_v22 = vshrl.u32 %v81_v16, 7  ;;  %s104_s4 = sshll.u32 %s193_s1, 4  ;;  %vm95_vm0 = vcmp.lt.s32.totalorder %v81_v16, 256  ;;  %s105_s4 = int_to_ptr.vmem [resolvable:$true] %s104_s4 }
  0x28   :  { %v80_v21 = vunpack.c.0.s8 %v79_v15  ;;  %s162_s5 = scalar_lea.vmem %s105_s4, 32  ;;  %p167_p3 = scmp.lt.s32.totalorder %s105_s4, %s105_s4 }
  0x29   :  { %v48_v6 = vand.u32 2147483647, %v46_v4  ;;  %v49_v7 = vand.u32 2147483647, %v47_v5  ;;  %p163_p2 = scmp.ne.s32.totalorder %s105_s4, %s162_s5  ;;  %p168_p4 = scmp.lt.s32.totalorder %s162_s5, %s162_s5 }
  0x2a   :  { %v83_v27 = vsub.s32 %v80_v21, %v82_v22 }
  0x2b   :  { %v61_v8 = vrot.slane %v48_v6, 4  ;;  %v67_v9 = vrot.slane %v49_v7, 4  ;;  %p169_p5 = por %p168_p4, %p167_p3 }
  0x2d   :  { %v62_v10 = vadd.f32 %v61_v8, %v48_v6  ;;  %v68_v11 = vadd.f32 %v67_v9, %v49_v7  ;;  %p170_p6 = pnand %p169_p5, %p163_p2 }
  0x2f   :  { %v63_v12 = vrot.slane %v62_v10, 2  ;;  %v69_v13 = vrot.slane %v68_v11, 2 }
  0x31   :  { %v64_v17 = vadd.f32 %v63_v12, %v62_v10  ;;  %v70_v18 = vadd.f32 %v69_v13, %v68_v11 }
  0x33   :  { %v65_v19 = vrot.slane %v64_v17, 1  ;;  %v71_v20 = vrot.slane %v70_v18, 1 }
  0x35   :  { %v66_v23 = vadd.f32 %v65_v19, %v64_v17  ;;  %v72_v24 = vadd.f32 %v71_v20, %v70_v18 }
  0x37   :  { %v73_v25 = vmul.f32 0.125, %v66_v23  ;;  %v74_v26 = vmul.f32 0.125, %v72_v24 }
  0x39   :  { %v77_v28 = vcombine.low %v73_v25, %v74_v26 }
  0x3b   :  { %v84_v29 = vrot.slane %v77_v28, %v83_v27 }
  0x3d   :  { %v91_v30 = vrot.slane %v84_v29, %v83_v27 }
  0x3f   :  { %97 = vst.msk [vmem:[#allocation8] sm:$0x3] %vm95_vm0, %v91_v30 }
  0x40   :  { %173 = shalt.err (!%p170_p6)
}
  0x41   :  { %s174_s8 = scalar_lea.hbm %s247_s2, 32 }
  0x42   :  { %p175_p7 = scmp.ne.s32.totalorder %s247_s2, %s174_s8  ;;  %p178_p8 = scmp.lt.u32.totalorder %s174_s8, %s247_s2 }
  0x44   :  { %p180_p9 = pnand %p178_p8, %p175_p7 }
  0x46   :  { %183 = shalt.err (!%p180_p9)
}
  0x47   :  { %107 = dma.vmem_to_hbm [thread:$0]  %s105_s4, 32, %s247_s2, [#allocation5]  }
  0x48   :  { %188 = dma.done.wait [#allocation5], 32  }
  0x49   :  { %189 = vsyncadd [#allocation5], 4294967264 }
  0x4a   :  { %111 = vsyncpa [#allocation4], 1 }
  0x4b   :  { %112 = vsyncpa [#allocation7], 1 }
  0x4c   :  { %113 = vsyncpa [#allocation5], 1 }

</bundles_post_ra>
